<compile_context>
chip_gen: v7x
topology: tpu7x:2x2x1
jax: 0.10.0
libtpu: 0.0.40
codegen_flags: <defaults>
</compile_context>

<pallas_src>
import math

import jax
import jax.numpy as jnp
from jax.experimental import pallas as pl
from jax.experimental.pallas import tpu as pltpu


def _copy_kernel(x_ref, o_ref):
    # Identity copy of the current (tile_r, cols) tile.
    o_ref[...] = x_ref[...]


def _sublane_multiple(dtype) -> int:
    # Sub-32-bit dtypes pack along sublanes: 8 rows for 4-byte elements,
    # 16 for 2-byte (bf16), 32 for 1-byte (int8/fp8).
    itemsize = jnp.dtype(dtype).itemsize
    return 8 * max(1, 4 // max(itemsize, 1))


# Per-tile byte budget. With double-buffering of input and output tiles the
# peak VMEM is ~4x this, which stays well under the scoped VMEM limit on all
# generations (incl. v7x's 64 MiB physical / 32 MiB default scoped VMEM).
_TARGET_TILE_BYTES = 4 * 1024 * 1024


def _pallas_identity_copy(x2d: jax.Array) -> jax.Array:
    """Tiled identity copy of a 2-D slab through a Pallas kernel."""
    rows, cols = x2d.shape
    itemsize = jnp.dtype(x2d.dtype).itemsize
    sub = _sublane_multiple(x2d.dtype)

    # Rows per tile: large enough to amortize the ~0.35 us per-grid-step
    # overhead, bounded by the VMEM budget above.
    cap_rows = max(sub, _TARGET_TILE_BYTES // max(cols * itemsize, 1))
    if rows <= cap_rows:
        tile_r = rows                        # single block along rows (full dim)
    else:
        tile_r = (cap_rows // sub) * sub     # multiple of the sublane packing

    grid = (pl.cdiv(rows, tile_r),)

    return pl.pallas_call(
        _copy_kernel,
        out_shape=jax.ShapeDtypeStruct((rows, cols), x2d.dtype),
        grid_spec=pltpu.PrefetchScalarGridSpec(
            num_scalar_prefetch=0,
            grid=grid,
            in_specs=[pl.BlockSpec((tile_r, cols), lambda i: (i, 0))],
            out_specs=pl.BlockSpec((tile_r, cols), lambda i: (i, 0)),
        ),
        compiler_params=pltpu.CompilerParams(
            # On v7x the single grid axis shards across the 2 TensorCores;
            # no-op (but harmless) on v5e/v6e.
            dimension_semantics=("parallel",),
        ),
        cost_estimate=pl.CostEstimate(
            flops=0,
            transcendentals=0,
            bytes_accessed=2 * rows * cols * itemsize,
        ),
        # Pure identity copy: let the output alias the input HBM buffer.
        input_output_aliases={0: 0},
    )(x2d)


def flatten(x: jax.Array) -> jax.Array:
    """Pallas equivalent of torch `x.view(-1, x.size(-1))`."""
    n = x.shape[-1] if x.ndim >= 1 else 1
    m = math.prod(x.shape[:-1]) if x.ndim > 1 else 1
    total = m * n

    if total == 0:
        # Nothing to copy; the reshape is pure metadata.
        return jnp.reshape(x, (m, n))

    # Lane-dense slab: give the copy a last dim that is a large multiple of
    # 128 so every store is a full-width vst, regardless of how small n is.
    lane_width = None
    for cand in (4096, 2048, 1024, 512, 256, 128):
        if total % cand == 0:
            lane_width = cand
            break

    if lane_width is not None:
        slab = jnp.reshape(x, (total // lane_width, lane_width))
    else:
        # Total element count not a multiple of 128: fall back to the natural
        # (m, n) layout (block last dim == full dim is always legal).
        slab = jnp.reshape(x, (m, n))

    out = _pallas_identity_copy(slab)
    return jnp.reshape(out, (m, n))


if __name__ == "__main__":
    key = jax.random.PRNGKey(0)
    # Small NCHW-style input consistent with a conv-stack usage of Flatten.
    x = jax.random.normal(key, (2, 4, 16, 16), dtype=jnp.float32)

    y = jax.jit(flatten)(x)
    y = jax.block_until_ready(y)

    # Reference: plain JAX reshape (exact semantics of x.view(-1, x.size(-1))).
    y_ref = jnp.reshape(x, (-1, x.shape[-1]))
    assert y.shape == (2 * 4 * 16, 16), y.shape
    assert y.dtype == x.dtype
    assert bool(jnp.array_equal(y, y_ref))

    print("KERNEL_OK")
</pallas_src>

<mosaic_0001>
module attributes {stable_mosaic.version = 11 : i64} {
  func.func @_copy_kernel(%arg0: i32, %arg1: memref<1x2048xf32, #tpu.memory_space<vmem>>, %arg2: memref<1x2048xf32, #tpu.memory_space<vmem>>) attributes {dimension_semantics = [#tpu.dimension_semantics<parallel>], iteration_bounds = array<i64: 1>, scalar_prefetch = 0 : i64, scratch_operands = 0 : i64, tpu.core_type = #tpu.core_type<tc>, window_params = [{transform_indices = @transform_0, window_bounds = array<i64: 1, 2048>}, {transform_indices = @transform_1, window_bounds = array<i64: 1, 2048>}]} {
    %c0 = arith.constant 0 : index
    %c0_0 = arith.constant 0 : index
    %0 = vector.load %arg1[%c0, %c0_0] : memref<1x2048xf32, #tpu.memory_space<vmem>>, vector<1x2048xf32>
    %c0_1 = arith.constant 0 : index
    %c0_2 = arith.constant 0 : index
    %1 = vector.load %arg2[%c0_1, %c0_2] : memref<1x2048xf32, #tpu.memory_space<vmem>>, vector<1x2048xf32>
    tpu.vector_store %arg2[%c0_1, %c0_2], %0 {strides = array<i32>} : memref<1x2048xf32, #tpu.memory_space<vmem>>, vector<1x2048xf32>,
    return
  }
  func.func @transform_0(%arg0: i32) -> (i32, i32) {
    %c0_i32 = arith.constant 0 : i32
    %c0_i32_0 = arith.constant 0 : i32
    return %arg0, %c0_i32 : i32, i32
  }
  func.func @transform_1(%arg0: i32) -> (i32, i32) {
    %c0_i32 = arith.constant 0 : i32
    %c0_i32_0 = arith.constant 0 : i32
    return %arg0, %c0_i32 : i32, i32
  }
}

</mosaic_0001>

<bundles_post_ra>
// kernel: flatten.1
= control target key start
LH: loop header
LB: loop body
LE: loop exit
PB: predicated region body
PF: predicated region fallthrough
CT: control target
= control target key end

     0   :  { %s38_s0 = inlined_call_operand.vmem [shape: f32[1,2048], index: 0, kind: input, shape index: {}, may-alias: {0,1}]   ;;  %s39_s1 = inlined_call_operand.vmem [shape: f32[1,2048], index: 1, kind: output, shape index: {}, may-alias: {0,1}]  }
   0x1   :  { %v8_v0 = vld [vmem:[%s38_s0] sm:$0xff]  ;;  %v9_v1 = vld [vmem:[%s38_s0 + $0x8] sm:$0xff] }
   0x2   :  { %10 = vst [vmem:[%s39_s1] sm:$0xff] %v8_v0  ;;  %11 = vst [vmem:[%s39_s1 + $0x8] sm:$0xff] %v9_v1 }

</bundles_post_ra>
